<compile_context>
chip_gen: v7x
topology: tpu7x:2x2x1
jax: 0.10.0
libtpu: 0.0.40
codegen_flags: <defaults>
</compile_context>

<pallas_src>
import functools

import jax
import jax.numpy as jnp
from jax.experimental import pallas as pl
from jax.experimental.pallas import tpu as pltpu

INIT_FEATURES = 784
HIDDEN_LAYER_1_FEATURES = 256
HIDDEN_LAYER_2_FEATURES = 128
NUM_CLASSES = 10

TB_MAX = 1024            # max batch-tile rows (sublane-aligned); ~6.5 MiB x buffers
VMEM_LIMIT_BYTES = 32 << 20


def _round_up(n, m):
    return ((n + m - 1) // m) * m


def _choose_tile(batch, tb_max=TB_MAX):
    """Pick a sublane-aligned batch tile with minimal padded tail and >=2 tiles
    when the batch is large enough (so v7x's second TensorCore gets work)."""
    b8 = _round_up(max(batch, 1), 8)
    n_tiles = max(pl.cdiv(b8, tb_max), 2 if b8 >= 16 else 1)
    tb = _round_up(pl.cdiv(b8, n_tiles), 8)
    b_pad = tb * pl.cdiv(b8, tb)
    return tb, b_pad


def _mlp_kernel(x_ref, w1_ref, b1_ref, w2_ref, b2_ref, w3_ref, b3_ref, o_ref):
    # first_hidden = input(x)         (bf16 MXU operands, f32 accumulation)
    xb = x_ref[...].astype(jnp.bfloat16)
    h1 = jnp.dot(xb, w1_ref[...], preferred_element_type=jnp.float32) + b1_ref[...]
    # hidden_2 = dropout(hidden_2(relu(first_hidden)))   -- dropout == identity
    a1 = jnp.maximum(h1, 0.0).astype(jnp.bfloat16)
    h2 = jnp.dot(a1, w2_ref[...], preferred_element_type=jnp.float32) + b2_ref[...]
    # logits = dropout(logits(relu(hidden_2)))           -- dropout == identity
    a2 = jnp.maximum(h2, 0.0).astype(jnp.bfloat16)
    logits = jnp.dot(a2, w3_ref[...], preferred_element_type=jnp.float32) + b3_ref[...]
    o_ref[...] = logits.astype(o_ref.dtype)


def prepare_params(params):
    """One-time parameter prep (bf16 MXU weights, f32 biases). Call once, reuse."""
    return {
        "w1": params["w1"].astype(jnp.bfloat16),   # (784, 256)
        "w2": params["w2"].astype(jnp.bfloat16),   # (256, 128)
        "w3": params["w3"].astype(jnp.bfloat16),   # (128, 10)
        "b1": params["b1"].astype(jnp.float32),    # (1, 256)
        "b2": params["b2"].astype(jnp.float32),    # (1, 128)
        "b3": params["b3"].astype(jnp.float32),    # (1, 10)
    }


@jax.jit
def mnist_mlp_forward(x, prepared):
    """x: (B, 784) float32. prepared: output of prepare_params().

    Returns (B, NUM_CLASSES) float32 logits.
    """
    B = x.shape[0]
    tb, b_pad = _choose_tile(B)
    num_tiles = pl.cdiv(b_pad, tb)

    # Only batch-row padding (if B isn't a tile multiple); no feature padding.
    if b_pad != B:
        xp = jnp.zeros((b_pad, INIT_FEATURES), x.dtype).at[:B].set(x)
    else:
        xp = x

    const = lambda i: (0, 0)   # weights/biases resident across batch tiles
    out_padded = pl.pallas_call(
        _mlp_kernel,
        out_shape=jax.ShapeDtypeStruct((b_pad, NUM_CLASSES), jnp.float32),
        grid=(num_tiles,),
        in_specs=[
            pl.BlockSpec((tb, INIT_FEATURES), lambda i: (i, 0)),                        # x tile
            pl.BlockSpec((INIT_FEATURES, HIDDEN_LAYER_1_FEATURES), const),              # w1
            pl.BlockSpec((1, HIDDEN_LAYER_1_FEATURES), const),                          # b1
            pl.BlockSpec((HIDDEN_LAYER_1_FEATURES, HIDDEN_LAYER_2_FEATURES), const),    # w2
            pl.BlockSpec((1, HIDDEN_LAYER_2_FEATURES), const),                          # b2
            pl.BlockSpec((HIDDEN_LAYER_2_FEATURES, NUM_CLASSES), const),                # w3
            pl.BlockSpec((1, NUM_CLASSES), const),                                      # b3
        ],
        out_specs=pl.BlockSpec((tb, NUM_CLASSES), lambda i: (i, 0)),
        compiler_params=pltpu.CompilerParams(
            dimension_semantics=("parallel",),
            vmem_limit_bytes=VMEM_LIMIT_BYTES),
    )(xp, prepared["w1"], prepared["b1"], prepared["w2"], prepared["b2"],
      prepared["w3"], prepared["b3"])

    if b_pad != B:
        return out_padded[:B]
    return out_padded


def init_params(key):
    """Deterministic init mirroring nn.Linear defaults + normal(0, 0.2) logits weight."""
    k1, k2, k3, k4, k5, k6 = jax.random.split(key, 6)

    def linear_init(kw, kb, fan_in, fan_out):
        bound = 1.0 / jnp.sqrt(fan_in)
        w = jax.random.uniform(kw, (fan_in, fan_out), jnp.float32, -bound, bound)
        b = jax.random.uniform(kb, (1, fan_out), jnp.float32, -bound, bound)
        return w, b

    w1, b1 = linear_init(k1, k2, INIT_FEATURES, HIDDEN_LAYER_1_FEATURES)
    w2, b2 = linear_init(k3, k4, HIDDEN_LAYER_1_FEATURES, HIDDEN_LAYER_2_FEATURES)
    # logits layer: weight ~ N(0, 0.2), bias keeps default uniform init
    w3 = 0.2 * jax.random.normal(k5, (HIDDEN_LAYER_2_FEATURES, NUM_CLASSES), jnp.float32)
    b3_bound = 1.0 / jnp.sqrt(HIDDEN_LAYER_2_FEATURES)
    b3 = jax.random.uniform(k6, (1, NUM_CLASSES), jnp.float32, -b3_bound, b3_bound)
    return {"w1": w1, "b1": b1, "w2": w2, "b2": b2, "w3": w3, "b3": b3}


def _reference(x, p):
    """Pure-JAX reference replicating the kernel's bf16-operand / f32-accum math."""
    xb = x.astype(jnp.bfloat16)
    h1 = jnp.dot(xb, p["w1"].astype(jnp.bfloat16),
                 preferred_element_type=jnp.float32) + p["b1"]
    a1 = jnp.maximum(h1, 0.0).astype(jnp.bfloat16)
    h2 = jnp.dot(a1, p["w2"].astype(jnp.bfloat16),
                 preferred_element_type=jnp.float32) + p["b2"]
    a2 = jnp.maximum(h2, 0.0).astype(jnp.bfloat16)
    return jnp.dot(a2, p["w3"].astype(jnp.bfloat16),
                   preferred_element_type=jnp.float32) + p["b3"]


if __name__ == "__main__":
    key = jax.random.PRNGKey(0)
    kx, kp = jax.random.split(key)
    B = 16   # small, but still exercises 2 batch tiles (tb=8, grid=(2,))
    x = jax.random.normal(kx, (B, INIT_FEATURES), jnp.float32)
    params = init_params(kp)
    prepared = prepare_params(params)

    out = mnist_mlp_forward(x, prepared)
    out = jax.block_until_ready(out)

    ref = _reference(x, params)
    assert out.shape == (B, NUM_CLASSES)
    assert jnp.allclose(out, ref, atol=2e-2, rtol=2e-2), (
        f"max abs err {jnp.max(jnp.abs(out - ref))}")
    print("KERNEL_OK")
</pallas_src>

<mosaic_0001>
module attributes {stable_mosaic.version = 11 : i64} {
  func.func @_mlp_kernel(%arg0: i32, %arg1: memref<8x784xf32, #tpu.memory_space<vmem>>, %arg2: memref<784x256xbf16, #tpu.memory_space<vmem>>, %arg3: memref<1x256xf32, #tpu.memory_space<vmem>>, %arg4: memref<256x128xbf16, #tpu.memory_space<vmem>>, %arg5: memref<1x128xf32, #tpu.memory_space<vmem>>, %arg6: memref<128x10xbf16, #tpu.memory_space<vmem>>, %arg7: memref<1x10xf32, #tpu.memory_space<vmem>>, %arg8: memref<8x10xf32, #tpu.memory_space<vmem>>) attributes {dimension_semantics = [#tpu.dimension_semantics<parallel>], iteration_bounds = array<i64: 2>, scalar_prefetch = 0 : i64, scratch_operands = 0 : i64, tpu.core_type = #tpu.core_type<tc>, window_params = [{transform_indices = @transform_0, window_bounds = array<i64: 8, 784>}, {pipeline_mode = #tpu.pipeline_mode<synchronous>, transform_indices = @transform_1, window_bounds = array<i64: 784, 256>}, {pipeline_mode = #tpu.pipeline_mode<synchronous>, transform_indices = @transform_2, window_bounds = array<i64: 1, 256>}, {pipeline_mode = #tpu.pipeline_mode<synchronous>, transform_indices = @transform_3, window_bounds = array<i64: 256, 128>}, {pipeline_mode = #tpu.pipeline_mode<synchronous>, transform_indices = @transform_4, window_bounds = array<i64: 1, 128>}, {pipeline_mode = #tpu.pipeline_mode<synchronous>, transform_indices = @transform_5, window_bounds = array<i64: 128, 10>}, {pipeline_mode = #tpu.pipeline_mode<synchronous>, transform_indices = @transform_6, window_bounds = array<i64: 1, 10>}, {transform_indices = @transform_7, window_bounds = array<i64: 8, 10>}]} {
    %c0 = arith.constant 0 : index
    %c0_0 = arith.constant 0 : index
    %0 = vector.load %arg1[%c0, %c0_0] : memref<8x784xf32, #tpu.memory_space<vmem>>, vector<8x784xf32>
    %1 = arith.truncf %0 : vector<8x784xf32> to vector<8x784xbf16>
    %c0_1 = arith.constant 0 : index
    %c0_2 = arith.constant 0 : index
    %2 = vector.load %arg2[%c0_1, %c0_2] : memref<784x256xbf16, #tpu.memory_space<vmem>>, vector<784x256xbf16>
    %cst = arith.constant dense<0.000000e+00> : vector<8x256xf32>
    %3 = tpu.matmul %1, %2, %cst {dimension_numbers = #tpu.dot_dimension_numbers<[1], [0], [0], [1], [0, 0, 1, 1], [], []>} : vector<8x784xbf16>, vector<784x256xbf16>, vector<8x256xf32> -> vector<8x256xf32>
    %c0_3 = arith.constant 0 : index
    %c0_4 = arith.constant 0 : index
    %4 = vector.load %arg3[%c0_3, %c0_4] : memref<1x256xf32, #tpu.memory_space<vmem>>, vector<1x256xf32>
    %5 = vector.broadcast %4 : vector<1x256xf32> to vector<8x256xf32>
    %6 = arith.addf %3, %5 : vector<8x256xf32>
    %cst_5 = arith.constant 0.000000e+00 : f32
    %7 = vector.broadcast %cst_5 : f32 to vector<8x256xf32>
    %8 = arith.maximumf %6, %7 : vector<8x256xf32>
    %9 = arith.truncf %8 : vector<8x256xf32> to vector<8x256xbf16>
    %c0_6 = arith.constant 0 : index
    %c0_7 = arith.constant 0 : index
    %10 = vector.load %arg4[%c0_6, %c0_7] : memref<256x128xbf16, #tpu.memory_space<vmem>>, vector<256x128xbf16>
    %cst_8 = arith.constant dense<0.000000e+00> : vector<8x128xf32>
    %11 = tpu.matmul %9, %10, %cst_8 {dimension_numbers = #tpu.dot_dimension_numbers<[1], [0], [0], [1], [0, 0, 1, 1], [], []>} : vector<8x256xbf16>, vector<256x128xbf16>, vector<8x128xf32> -> vector<8x128xf32>
    %c0_9 = arith.constant 0 : index
    %c0_10 = arith.constant 0 : index
    %12 = vector.load %arg5[%c0_9, %c0_10] : memref<1x128xf32, #tpu.memory_space<vmem>>, vector<1x128xf32>
    %13 = vector.broadcast %12 : vector<1x128xf32> to vector<8x128xf32>
    %14 = arith.addf %11, %13 : vector<8x128xf32>
    %cst_11 = arith.constant 0.000000e+00 : f32
    %15 = vector.broadcast %cst_11 : f32 to vector<8x128xf32>
    %16 = arith.maximumf %14, %15 : vector<8x128xf32>
    %17 = arith.truncf %16 : vector<8x128xf32> to vector<8x128xbf16>
    %c0_12 = arith.constant 0 : index
    %c0_13 = arith.constant 0 : index
    %18 = vector.load %arg6[%c0_12, %c0_13] : memref<128x10xbf16, #tpu.memory_space<vmem>>, vector<128x10xbf16>
    %cst_14 = arith.constant dense<0.000000e+00> : vector<8x10xf32>
    %19 = tpu.matmul %17, %18, %cst_14 {dimension_numbers = #tpu.dot_dimension_numbers<[1], [0], [0], [1], [0, 0, 1, 1], [], []>} : vector<8x128xbf16>, vector<128x10xbf16>, vector<8x10xf32> -> vector<8x10xf32>
    %c0_15 = arith.constant 0 : index
    %c0_16 = arith.constant 0 : index
    %20 = vector.load %arg7[%c0_15, %c0_16] : memref<1x10xf32, #tpu.memory_space<vmem>>, vector<1x10xf32>
    %21 = vector.broadcast %20 : vector<1x10xf32> to vector<8x10xf32>
    %22 = arith.addf %19, %21 : vector<8x10xf32>
    %c0_17 = arith.constant 0 : index
    %c0_18 = arith.constant 0 : index
    %23 = vector.load %arg8[%c0_17, %c0_18] : memref<8x10xf32, #tpu.memory_space<vmem>>, vector<8x10xf32>
    tpu.vector_store %arg8[%c0_17, %c0_18], %22 {strides = array<i32>} : memref<8x10xf32, #tpu.memory_space<vmem>>, vector<8x10xf32>,
    return
  }
  func.func @transform_0(%arg0: i32) -> (i32, i32) {
    %c0_i32 = arith.constant 0 : i32
    %c0_i32_0 = arith.constant 0 : i32
    return %arg0, %c0_i32 : i32, i32
  }
  func.func @transform_1(%arg0: i32) -> (i32, i32) {
    %c0_i32 = arith.constant 0 : i32
    %c0_i32_0 = arith.constant 0 : i32
    %c0_i32_1 = arith.constant 0 : i32
    return %c0_i32, %c0_i32_0 : i32, i32
  }
  func.func @transform_2(%arg0: i32) -> (i32, i32) {
    %c0_i32 = arith.constant 0 : i32
    %c0_i32_0 = arith.constant 0 : i32
    %c0_i32_1 = arith.constant 0 : i32
    return %c0_i32, %c0_i32_0 : i32, i32
  }
  func.func @transform_3(%arg0: i32) -> (i32, i32) {
    %c0_i32 = arith.constant 0 : i32
    %c0_i32_0 = arith.constant 0 : i32
    %c0_i32_1 = arith.constant 0 : i32
    return %c0_i32, %c0_i32_0 : i32, i32
  }
  func.func @transform_4(%arg0: i32) -> (i32, i32) {
    %c0_i32 = arith.constant 0 : i32
    %c0_i32_0 = arith.constant 0 : i32
    %c0_i32_1 = arith.constant 0 : i32
    return %c0_i32, %c0_i32_0 : i32, i32
  }
  func.func @transform_5(%arg0: i32) -> (i32, i32) {
    %c0_i32 = arith.constant 0 : i32
    %c0_i32_0 = arith.constant 0 : i32
    %c0_i32_1 = arith.constant 0 : i32
    return %c0_i32, %c0_i32_0 : i32, i32
  }
  func.func @transform_6(%arg0: i32) -> (i32, i32) {
    %c0_i32 = arith.constant 0 : i32
    %c0_i32_0 = arith.constant 0 : i32
    %c0_i32_1 = arith.constant 0 : i32
    return %c0_i32, %c0_i32_0 : i32, i32
  }
  func.func @transform_7(%arg0: i32) -> (i32, i32) {
    %c0_i32 = arith.constant 0 : i32
    %c0_i32_0 = arith.constant 0 : i32
    return %arg0, %c0_i32 : i32, i32
  }
}

</mosaic_0001>

<bundles_post_ra>
// kernel: mnist_mlp_forward.1
= control target key start
LH: loop header
LB: loop body
LE: loop exit
PB: predicated region body
PF: predicated region fallthrough
CT: control target
= control target key end

     0   :  { %s2435_s0 = inlined_call_operand.hbm [shape: f32[16,784], index: 0, kind: input, shape index: {}]   ;;  %s2436_s1 = inlined_call_operand.hbm [shape: bf16[784,256], index: 1, kind: input, shape index: {}]   ;;  %s2437_s2 = inlined_call_operand.vmem [shape: f32[1,256], index: 2, kind: input, shape index: {}]   ;;  %s2438_s3 = inlined_call_operand.hbm [shape: bf16[256,128], index: 3, kind: input, shape index: {}]   ;;  %s2439_s4 = inlined_call_operand.vmem [shape: f32[1,128], index: 4, kind: input, shape index: {}]   ;;  %s2440_s5 = inlined_call_operand.vmem [shape: bf16[128,10], index: 5, kind: input, shape index: {}]   ;;  %s2441_s6 = inlined_call_operand.vmem [shape: f32[1,10], index: 6, kind: input, shape index: {}]   ;;  %s2442_s7 = inlined_call_operand.hbm [shape: f32[16,10], index: 7, kind: output, shape index: {}]  }
   0x1   :  { %2446 = sst [smem:[#allocation12_spill]] %s2436_s1 }
   0x2   :  { %12 = vsyncpa [#allocation3], 0 }
   0x3   :  { %14 = vsyncpa [#allocation3 + $0x1], 0 }
   0x4   :  { %15 = vsyncpa [#allocation6], 0 }
   0x5   :  { %16 = vsyncpa [#allocation4], 0 }
   0x6   :  { %18 = vsyncpa [#allocation4 + $0x1], 0  ;;  %s2163_s24 = smov 0   ;;  %s2165_s25 = smov 0  }
   0x7   :  { %s2167_s26 = smov 0   ;;  %s2169_s27 = smov 0  }
   0x8 LB: > { %s2184_s28 = sadd.s32 4294967295, %s2110_s27   ;;  %s1504_s29 = sadd.s32 4294967294, %s2110_s27   ;;  %s2110_s27 = sphi %s2169_s27, %s2464_s27   ;;  %s2106_s26 = sphi %s2167_s26, %s2463_s26   ;;  %s2102_s25 = sphi %s2165_s25, %s2462_s25   ;;  %s2098_s24 = sphi %s2163_s24, %s2461_s24  }
   0x9   : > { %p44_p0 = scmp.ne.s32.totalorder %s2102_s25, %s2098_s24  ;;  %p2443_p1 = scmp.eq.s32.totalorder %s2184_s28, 0 }
   0xa   : > { %p200_p3 = scmp.eq.s32.totalorder %s1504_s29, 1  ;;  %p1505_p5 = scmp.ge.s32.totalorder %s2110_s27, 1 }
   0xb   : > { %p2193_p4 = por %p2443_p1, %p44_p0  ;;  %p207_p7 = scmp.lt.s32.totalorder %s2110_s27, 3 }
   0xc   : > { %p2198_p6 = por %p200_p3, %p44_p0  ;;  %s2112_s10 = smov [#allocation5]  }
   0xd   : > { %s2447_s30 = scalar_select %p2193_p4, 1, 0 }
   0xe   : > { %s2448_s8 = scalar_select %p2198_p6, 1, 0 }
   0xf   : > { %p2203_p8 = pnand %p1505_p5, %p207_p7  ;;  %s219_s11 = sshll.u32 %s2112_s10, 4  ;;  %s2207_s11 = int_to_ptr.vmem [resolvable:$true] %s219_s11 }
  0x10   : > { %s2113_s13 = smov [#allocation7]   ;;  %s2451_s1 = sld [smem:[#allocation12_spill]] }
  0x11   : > { %p1721_p9 = pneg %p2203_p8  ;;  %s235_s14 = sshll.u32 %s2113_s13, 4  ;;  %s2218_s14 = int_to_ptr.vmem [resolvable:$true] %s235_s14 }
  0x13   : > { %p2214_p11 = pnand %p1721_p9, %p2443_p1 }
  0x15   : > { %p1956_p13 = pneg %p2214_p11 }
  0x16   : > { %s1954_s17 = scalar_lea.hbm %s2451_s1, 12544 }
  0x17   : > { %p1955_p12 = scmp.ne.s32.totalorder %s2451_s1, %s1954_s17  ;;  %p1961_p5 = scmp.lt.u32.totalorder %s1954_s17, %s2451_s1 }
  0x19   : > { %p1957_p0 = pnand %p1956_p13, %p1955_p12 }
  0x1b   : > { %p1958_p3 = pneg %p1957_p0 }
  0x1d   : > { %p1963_p7 = pnand %p1961_p5, %p1958_p3 }
  0x1f   : > { %1966 = shalt.err (!%p1963_p7)
}
  0x20   : > { %s1967_s22 = scalar_lea.vmem %s2207_s11, 12544  ;;  %p1975_p2 = scmp.lt.s32.totalorder %s2207_s11, %s2207_s11 }
  0x21   : > { %p1968_p9 = scmp.ne.s32.totalorder %s2207_s11, %s1967_s22  ;;  %p1976_p12 = scmp.lt.s32.totalorder %s1967_s22, %s1967_s22 }
  0x23   : > { %p1970_p10 = pnand %p1968_p9, %p1956_p13  ;;  %p1977_p0 = por %p1976_p12, %p1975_p2 }
  0x25   : > { %p1971_p1 = pneg %p1970_p10 }
  0x27   : > { %p1978_p6 = pnand %p1977_p0, %p1971_p1 }
  0x29   : > { %1981 = shalt.err (!%p1978_p6)
}
  0x2a   : > { %s2114_s23 = smov 128   ;;  %s2115_s29 = smov 8  }
  0x2b   : > { %1724 = dma.hbm_to_vmem [thread:$0]  (!%p2214_p11), %s2451_s1, 12544, %s2207_s11, [#allocation6], %s2114_s23, %s2114_s23, %s2115_s29  }
  0x2c   : > { %s1982_s17 = scalar_lea.hbm %s2438_s3, 2048 }
  0x2d   : > { %p1983_p2 = scmp.ne.s32.totalorder %s2438_s3, %s1982_s17  ;;  %p1989_p10 = scmp.lt.u32.totalorder %s1982_s17, %s2438_s3 }
  0x2f   : > { %p1985_p1 = pnand %p1983_p2, %p1956_p13 }
  0x31   : > { %p1986_p6 = pneg %p1985_p1 }
  0x33   : > { %p1991_p3 = pnand %p1989_p10, %p1986_p6 }
  0x35   : > { %1994 = shalt.err (!%p1991_p3)
}
  0x36   : > { %s1995_s11 = scalar_lea.vmem %s2218_s14, 2048  ;;  %p2003_p12 = scmp.lt.s32.totalorder %s2218_s14, %s2218_s14 }
  0x37   : > { %p1996_p5 = scmp.ne.s32.totalorder %s2218_s14, %s1995_s11  ;;  %p2004_p0 = scmp.lt.s32.totalorder %s1995_s11, %s1995_s11 }
  0x39   : > { %p1998_p7 = pnand %p1996_p5, %p1956_p13  ;;  %p2005_p2 = por %p2004_p0, %p2003_p12 }
  0x3b   : > { %p1999_p9 = pneg %p1998_p7 }
  0x3d   : > { %p2006_p1 = pnand %p2005_p2, %p1999_p9 }
  0x3f   : > { %2009 = shalt.err (!%p2006_p1)
}
  0x40   : > { %s2116_s22 = smov 64   ;;  %s2117_s23 = smov 4  }
  0x41   : > { %1727 = dma.hbm_to_vmem [thread:$0]  (!%p2214_p11), %s2438_s3, 2048, %s2218_s14, [#allocation6], %s2116_s22, %s2116_s22, %s2117_s23  }
  0x42   : > { %s2273_s13 = sadd.s32 1, %s2110_s27   ;;  %s31_s16 = sadd.s32 1, %s2106_s26 }
  0x43   : > { %s28_s15 = ssub.s32 %s2110_s27, %s2273_s13  ;;  %p38_p6 = scmp.ne.s32.totalorder %s2106_s26, %s2102_s25 }
  0x44   : > { %p29_p13 = scmp.eq.s32.totalorder %s28_s15, 0  ;;  %p39_p10 = scmp.eq.s32.totalorder %s2110_s27, 0 }
  0x45   : > { %p2452_p5 = scmp.eq.s32.totalorder %s2184_s28, 1  ;;  %p1738_p9 = scmp.lt.s32.totalorder %s2110_s27, 2 }
  0x46   : > { %s2282_s17 = scalar_select %p29_p13, %s2106_s26, %s31_s16  }
  0x47   : > { %p40_p3 = por %p39_p10, %p38_p6  ;;  %p2286_p7 = por %p2452_p5, %p38_p6 }
  0x48   : > { %s258_s12 = sand.u32 1, %s2106_s26   ;;  %s1707_s14 = smul.u32 896, %s2110_s27 }
  0x49   : > { %s2453_s18 = scalar_select %p2286_p7, 1, 0 }
  0x4a   : > { %s1706_s19 = smul.u32 56, %s258_s12  ;;  %p2293_p11 = pnand %p1738_p9, %p40_p3 }
  0x4b   : > { %s2300_s22 = scalar_lea.hbm %s2435_s0, %s1707_s14  ;;  %s259_s10 = scalar_lea.sflag [#allocation3], %s258_s12 }
  0x4c   : > { %s262_s23 = scalar_lea.vmem [#allocation2], %s1706_s19  ;;  %s2010_s15 = scalar_lea.hbm %s2300_s22, 896 }
  0x4d   : > { %s270_s29 = sshll.u32 %s262_s23, 4  ;;  %p2011_p12 = scmp.ne.s32.totalorder %s2300_s22, %s2010_s15  ;;  %s2302_s29 = int_to_ptr.vmem [resolvable:$true] %s270_s29 }
  0x4e   : > { %p2012_p0 = pneg %p2293_p11  ;;  %s2015_s21 = scalar_lea.hbm %s2435_s0, 1792 }
  0x4f   : > { %p2016_p13 = scmp.lt.u32.totalorder %s2300_s22, %s2435_s0  ;;  %p2017_p6 = scmp.lt.u32.totalorder %s2015_s21, %s2010_s15 }
  0x50   : > { %p2013_p2 = pnand %p2012_p0, %p2011_p12  ;;  %p2019_p3 = scmp.lt.u32.totalorder %s2010_s15, %s2300_s22 }
  0x51   : > { %p2018_p10 = por %p2017_p6, %p2016_p13 }
  0x52   : > { %p2014_p1 = pneg %p2013_p2 }
  0x53   : > { %p2020_p5 = por %p2019_p3, %p2018_p10 }
  0x55   : > { %p2021_p9 = pnand %p2020_p5, %p2014_p1 }
  0x57   : > { %2024 = shalt.err (!%p2021_p9)
}
  0x58   : > { %s2025_s12 = scalar_lea.vmem %s2302_s29, 896  ;;  %s2118_s19 = smov [#allocation2]  }
  0x59   : > { %p2026_p12 = scmp.ne.s32.totalorder %s2302_s29, %s2025_s12  ;;  %s2030_s23 = sshll.u32 %s2118_s19, 4  ;;  %s2031_s23 = int_to_ptr.vmem [resolvable:$false] %s2030_s23 }
  0x5a   : > { %s2032_s1 = scalar_lea.vmem %s2031_s23, 1792  ;;  %p2033_p4 = scmp.lt.s32.totalorder %s2302_s29, %s2031_s23 }
  0x5b   : > { %p2028_p2 = pnand %p2026_p12, %p2012_p0  ;;  %p2034_p13 = scmp.lt.s32.totalorder %s2032_s1, %s2025_s12 }
  0x5d   : > { %p2029_p7 = pneg %p2028_p2  ;;  %p2035_p6 = por %p2034_p13, %p2033_p4 }
  0x5f   : > { %p2036_p10 = pnand %p2035_p6, %p2029_p7 }
  0x61   : > { %2039 = shalt.err (!%p2036_p10)
}
  0x62   : > { %1731 = dma.hbm_to_vmem [thread:$0]  (!%p2293_p11), %s2300_s22, 896, %s2302_s29, %s259_s10  }
  0x63   : > { %279 = sbr.rel (%p2203_p8) target bundleno = 920 (0x398), region = 48  ;;  %s2332_s15 = sand.u32 (!%p2203_p8), 1, %s2102_s25  }
  0x64   : > { %s1708_s16 = smul.u32 (!%p2203_p8), 56, %s2332_s15  ;;  %s282_s14 = scalar_lea.sflag (!%p2203_p8), [#allocation3], %s2332_s15 }
  0x65   : > { %p2455_p4 = scmp.ne.s32.totalorder (!%p2203_p8), %s2447_s30, 0 }
  0x66   : > { %s2336_s21 = scalar_lea.vmem (!%p2203_p8), [#allocation2], %s1708_s16 }
  0x6a   : > { %2085 = dma.done.wait (%p2455_p4), %s282_s14, 896  }
  0x6b   : > { %2087 = vsyncadd (%p2455_p4), %s282_s14, 4294966400  ;;  %p2456_p7 = scmp.eq.s32.totalorder %s2184_s28, 0 }
  0x6d   : > { %2089 = dma.done.wait (%p2456_p7), [#allocation6], 14592   ;;  %p2457_p8 = pmov %p2456_p7 }
  0x6e   : > { %v1783_v0 = vld [vmem:[#allocation5 + $0x104] ss:$8 sps:$4 sm:$0xff]   ;;  %v1785_v1 = vld [vmem:[#allocation5 + $0x100] ss:$8 sps:$4 sm:$0xff]   ;;  %v1786_v2 = vld [vmem:[#allocation5 + $0x114] ss:$8 sps:$4 sm:$0xff]  }
  0x6f   : > { %2091 = vsyncadd (%p2457_p8), [#allocation6], 4294952704  ;;  %984 = vmatprep.subr.bf16.mxu0 %v1783_v0  ;;  %v1788_v3 = vld [vmem:[#allocation5 + $0x110] ss:$8 sps:$4 sm:$0xff]   ;;  %v1789_v4 = vld [vmem:[#allocation5 + $0x124] ss:$8 sps:$4 sm:$0xff]  }
  0x70   : > { %985 = vmatpush1.bf16.msra.mxu0 %v1785_v1  ;;  %v1791_v5 = vld [vmem:[#allocation5 + $0x120] ss:$8 sps:$4 sm:$0xff]   ;;  %v1792_v6 = vld [vmem:[#allocation5 + $0x134] ss:$8 sps:$4 sm:$0xff]   ;;  %v1794_v7 = vld [vmem:[#allocation5 + $0x130] ss:$8 sps:$4 sm:$0xff]  }
  0x71   : > { %986 = vmatprep.subr.bf16.mxu0 %v1786_v2  ;;  %v1795_v8 = vld [vmem:[#allocation5 + $0x144] ss:$8 sps:$4 sm:$0xff]   ;;  %v1797_v9 = vld [vmem:[#allocation5 + $0x140] ss:$8 sps:$4 sm:$0xff]   ;;  %v1798_v10 = vld [vmem:[#allocation5 + $0x154] ss:$8 sps:$4 sm:$0xff]  }
  0x72   : > { %v1800_v11 = vld [vmem:[#allocation5 + $0x150] ss:$8 sps:$4 sm:$0xff]   ;;  %v1801_v12 = vld [vmem:[#allocation5 + $0x164] ss:$8 sps:$4 sm:$0xff]   ;;  %v1803_v15 = vld [vmem:[#allocation5 + $0x160] ss:$8 sps:$4 sm:$0xff]  }
  0x73   : > { %v328_v13 = vld [vmem:[%s2336_s21 + $0x18] sm:$0xff]  ;;  %v1804_v16 = vld [vmem:[#allocation5 + $0x174] ss:$8 sps:$4 sm:$0xff]   ;;  %v1806_v18 = vld [vmem:[#allocation5 + $0x170] ss:$8 sps:$4 sm:$0xff]   ;;  %vm939_vm0 = vcmask 130048  }
  0x74   : > { %987 = vmatpush1.bf16.msra.mxu0 %v1788_v3  ;;  %v335_v14 = vpack.c.bf16 %v328_v13, %v328_v13  ;;  %v1837_v17 = vld [vmem:[#allocation5 + $0x4] ss:$8 sps:$4 sm:$0xff]   ;;  %v1842_v20 = vld [vmem:[#allocation5] ss:$8 sps:$4 sm:$0xff]   ;;  %v1843_v21 = vld [vmem:[#allocation5 + $0x14] ss:$8 sps:$4 sm:$0xff]  }
  0x75   : > { %988 = vmatprep.subr.bf16.mxu0 %v1789_v4  ;;  %v1807_v19 = vld [vmem:[#allocation5 + $0x184] ss:$8 sps:$4 sm:$0xff]   ;;  %943 = vmatprep.subr.bf16.mxu1 %v1837_v17  ;;  %v1848_v22 = vld [vmem:[#allocation5 + $0x10] ss:$8 sps:$4 sm:$0xff]   ;;  %v1809_v24 = vld [vmem:[#allocation5 + $0x180] ss:$8 sps:$4 sm:$0xff]  }
  0x76   : > { %1016 = vmatprep.mubr.bf16.mxu0 %v335_v14  ;;  %944 = vmatpush1.bf16.msra.mxu1 %v1842_v20  ;;  %v1849_v23 = vld [vmem:[#allocation5 + $0x24] ss:$8 sps:$4 sm:$0xff]   ;;  %v1810_v25 = vld [vmem:[#allocation5 + $0x194] ss:$8 sps:$4 sm:$0xff]   ;;  %v1854_v26 = vld [vmem:[#allocation5 + $0x20] ss:$8 sps:$4 sm:$0xff]  }
  0x77   : > { %945 = vmatprep.subr.bf16.mxu1 %v1843_v21  ;;  %v1855_v27 = vld [vmem:[#allocation5 + $0x34] ss:$8 sps:$4 sm:$0xff]   ;;  %v1812_v28 = vld [vmem:[#allocation5 + $0x190] ss:$8 sps:$4 sm:$0xff]   ;;  %v1813_v29 = vld [vmem:[#allocation5 + $0x1a4] ss:$8 sps:$4 sm:$0xff]  }
  0x78   : > { %989 = vmatpush1.bf16.msra.mxu0 %v1791_v5  ;;  %v1860_v30 = vld [vmem:[#allocation5 + $0x30] ss:$8 sps:$4 sm:$0xff]   ;;  %v1861_v31 = vld [vmem:[#allocation5 + $0x44] ss:$8 sps:$4 sm:$0xff]   ;;  %v1815_v32 = vld [vmem:[#allocation5 + $0x1a0] ss:$8 sps:$4 sm:$0xff]  }
  0x79   : > { %990 = vmatprep.subr.bf16.mxu0 %v1792_v6  ;;  %v1816_v33 = vld [vmem:[#allocation5 + $0x1b4] ss:$8 sps:$4 sm:$0xff]   ;;  %v1866_v34 = vld [vmem:[#allocation5 + $0x40] ss:$8 sps:$4 sm:$0xff]   ;;  %v1818_v36 = vld [vmem:[#allocation5 + $0x1b0] ss:$8 sps:$4 sm:$0xff]  }
  0x7a   : > { %946 = vmatpush1.bf16.msra.mxu1 %v1848_v22  ;;  %v1867_v35 = vld [vmem:[#allocation5 + $0x54] ss:$8 sps:$4 sm:$0xff]   ;;  %v1819_v37 = vld [vmem:[#allocation5 + $0x1c4] ss:$8 sps:$4 sm:$0xff]   ;;  %v1872_v38 = vld [vmem:[#allocation5 + $0x50] ss:$8 sps:$4 sm:$0xff]  }
  0x7b   : > { %947 = vmatprep.subr.bf16.mxu1 %v1849_v23  ;;  %v1873_v39 = vld [vmem:[#allocation5 + $0x64] ss:$8 sps:$4 sm:$0xff]   ;;  %v1821_v40 = vld [vmem:[#allocation5 + $0x1c0] ss:$8 sps:$4 sm:$0xff]   ;;  %v1822_v41 = vld [vmem:[#allocation5 + $0x1d4] ss:$8 sps:$4 sm:$0xff]  }
  0x7c   : > { %991 = vmatpush1.bf16.msra.mxu0 %v1794_v7  ;;  %v1878_v42 = vld [vmem:[#allocation5 + $0x60] ss:$8 sps:$4 sm:$0xff]   ;;  %v1879_v43 = vld [vmem:[#allocation5 + $0x74] ss:$8 sps:$4 sm:$0xff]   ;;  %v1824_v44 = vld [vmem:[#allocation5 + $0x1d0] ss:$8 sps:$4 sm:$0xff]  }
  0x7d   : > { %992 = vmatprep.subr.bf16.mxu0 %v1795_v8  ;;  %v1825_v45 = vld [vmem:[#allocation5 + $0x1e4] ss:$8 sps:$4 sm:$0xff]   ;;  %v1884_v46 = vld [vmem:[#allocation5 + $0x70] ss:$8 sps:$4 sm:$0xff]   ;;  %v1827_v48 = vld [vmem:[#allocation5 + $0x1e0] ss:$8 sps:$4 sm:$0xff]  }
  0x7e   : > { %948 = vmatpush1.bf16.msra.mxu1 %v1854_v26  ;;  %v1885_v47 = vld [vmem:[#allocation5 + $0x84] ss:$8 sps:$4 sm:$0xff]   ;;  %v1828_v49 = vld [vmem:[#allocation5 + $0x1f4] ss:$8 sps:$4 sm:$0xff]   ;;  %v1890_v50 = vld [vmem:[#allocation5 + $0x80] ss:$8 sps:$4 sm:$0xff]  }
  0x7f   : > { %949 = vmatprep.subr.bf16.mxu1 %v1855_v27  ;;  %v1830_v51 = vld [vmem:[#allocation5 + $0x1f0] ss:$8 sps:$4 sm:$0xff]   ;;  %v1891_v52 = vld [vmem:[#allocation5 + $0x94] ss:$8 sps:$4 sm:$0xff]   ;;  %v1833_v54 = vld [vmem:[#allocation5 + $0x204] ss:$8 sps:$4 sm:$0xff]  }
  0x80   : > { %993 = vmatpush1.bf16.msra.mxu0 %v1797_v9  ;;  %v327_v53 = vld [vmem:[%s2336_s21 + $0x10] sm:$0xff]  ;;  %v330_v58 = vld [vmem:[%s2336_s21 + $0x28] sm:$0xff]  ;;  %v325_v21 = vld [vmem:[%s2336_s21] sm:$0xff]  ;;  %vm2121_vm1 = vmmov 0   ;;  %s1513_s11 = sshll.u32 %s2332_s15, 3  ;;  %s1640_s23 = sshll.u32 %s2184_s28, 7 }
  0x81   : > { %994 = vmatprep.subr.bf16.mxu0 %v1798_v10  ;;  %v1896_v55 = vld [vmem:[#allocation5 + $0x90] ss:$8 sps:$4 sm:$0xff]   ;;  %v1897_v56 = vld [vmem:[#allocation5 + $0xa4] ss:$8 sps:$4 sm:$0xff]   ;;  %v334_v57 = vpack.c.bf16 %v327_v53, %v327_v53  ;;  %v1831_v59 = vld [vmem:[#allocation5 + $0x200] ss:$8 sps:$4 sm:$0xff]   ;;  %v337_v60 = vpack.c.bf16 %v330_v58, %v330_v58  ;;  %s2391_s30 = scalar_lea.hbm %s2442_s7, %s1640_s23 }
  0x82   : > { %950 = vmatpush1.bf16.msra.mxu1 %v1860_v30  ;;  %v1836_v61 = vld [vmem:[#allocation5 + $0x214] ss:$8 sps:$4 sm:$0xff]   ;;  %v1902_v62 = vld [vmem:[#allocation5 + $0xa0] ss:$8 sps:$4 sm:$0xff]   ;;  %v1834_v1 = vld [vmem:[#allocation5 + $0x210] ss:$8 sps:$4 sm:$0xff]  }
  0x83   : > { %951 = vmatprep.subr.bf16.mxu1 %v1861_v31  ;;  %v1903_v63 = vld [vmem:[#allocation5 + $0xb4] ss:$8 sps:$4 sm:$0xff]   ;;  %v1841_v3 = vld [vmem:[#allocation5 + $0x224] ss:$8 sps:$4 sm:$0xff]   ;;  %v1908_v4 = vld [vmem:[#allocation5 + $0xb0] ss:$8 sps:$4 sm:$0xff]  }
  0x84   : > { %995 = vmatpush1.bf16.msra.mxu0 %v1800_v11  ;;  %v326_v0 = vld [vmem:[%s2336_s21 + $0x8] sm:$0xff]  ;;  %v1909_v5 = vld [vmem:[#allocation5 + $0xc4] ss:$8 sps:$4 sm:$0xff]   ;;  %v1839_v6 = vld [vmem:[#allocation5 + $0x220] ss:$8 sps:$4 sm:$0xff]   ;;  %s323_s1 = scalar_lea.vmem [#allocation8], %s1513_s11 }
  0x85   : > { %996 = vmatprep.subr.bf16.mxu0 %v1801_v12  ;;  %v333_v2 = vpack.c.bf16 %v326_v0, %v326_v0  ;;  %v1847_v7 = vld [vmem:[#allocation5 + $0x234] ss:$8 sps:$4 sm:$0xff]   ;;  %v1914_v8 = vld [vmem:[#allocation5 + $0xc0] ss:$8 sps:$4 sm:$0xff]   ;;  %v1845_v10 = vld [vmem:[#allocation5 + $0x230] ss:$8 sps:$4 sm:$0xff]  }
  0x86   : > { %952 = vmatpush1.bf16.msra.mxu1 %v1866_v34  ;;  %v1915_v9 = vld [vmem:[#allocation5 + $0xd4] ss:$8 sps:$4 sm:$0xff]   ;;  %v1853_v11 = vld [vmem:[#allocation5 + $0x244] ss:$8 sps:$4 sm:$0xff]   ;;  %v1851_v12 = vld [vmem:[#allocation5 + $0x240] ss:$8 sps:$4 sm:$0xff]  }
  0x87   : > { %953 = vmatprep.subr.bf16.mxu1 %v1867_v35  ;;  %975 = vmatprep.mubr.bf16.mxu1 %v333_v2  ;;  %v1920_v13 = vld [vmem:[#allocation5 + $0xd0] ss:$8 sps:$4 sm:$0xff]   ;;  %v1921_v14 = vld [vmem:[#allocation5 + $0xe4] ss:$8 sps:$4 sm:$0xff]   ;;  %v1927_v17 = vld [vmem:[#allocation5 + $0xf4] ss:$8 sps:$4 sm:$0xff]  }
  0x88   : > { %997 = vmatpush1.bf16.msra.mxu0 %v1803_v15  ;;  %v1859_v15 = vld [vmem:[#allocation5 + $0x254] ss:$8 sps:$4 sm:$0xff]   ;;  %v1929_v20 = vld [vmem:[#allocation5 + $0xf0] ss:$8 sps:$4 sm:$0xff]   ;;  %v1863_v23 = vld [vmem:[#allocation5 + $0x260] ss:$8 sps:$4 sm:$0xff]  }
  0x89   : > { %998 = vmatprep.subr.bf16.mxu0 %v1804_v16  ;;  %v1926_v16 = vld [vmem:[#allocation5 + $0xe0] ss:$8 sps:$4 sm:$0xff]   ;;  %v1930_v22 = vld [vmem:[#allocation7 + $0x40] sm:$0xff]   ;;  %v1932_v27 = vld [vmem:[#allocation7 + $0x48] sm:$0xff]   ;;  %s1415_s16 = sshll.u32 %s323_s1, 4  ;;  %vm1399_vm2 = vcmask 80896   ;;  %s2393_s16 = int_to_ptr.vmem [resolvable:$true] %s1415_s16 }
  0x8a   : > { %954 = vmatpush1.bf16.msra.mxu1 %v1872_v38  ;;  %v1931_v26 = vld [vmem:[#allocation7] sm:$0xff]   ;;  %v1933_v30 = vld [vmem:[#allocation7 + $0x8] sm:$0xff]   ;;  %v1934_v31 = vld [vmem:[#allocation7 + $0x50] sm:$0xff]   ;;  %s1402_s28 = scalar_lea.sflag [#allocation4], %s2332_s15  ;;  %s2040_s9 = scalar_lea.vmem %s2393_s16, 128 }
  0x8b   : > { %955 = vmatprep.subr.bf16.mxu1 %v1873_v39  ;;  %v1935_v34 = vld [vmem:[#allocation7 + $0x10] sm:$0xff]   ;;  %v1936_v35 = vld [vmem:[#allocation7 + $0x58] sm:$0xff]   ;;  %v1938_v39 = vld [vmem:[#allocation7 + $0x60] sm:$0xff]   ;;  %p2041_p11 = scmp.ne.s32.totalorder %s2393_s16, %s2040_s9  ;;  %p2458_p0 = scmp.ne.s32.totalorder %s2453_s18, 0 }
  0x8c   : > { %999 = vmatpush1.bf16.msra.mxu0 %v1806_v18  ;;  %v1857_v18 = vld [vmem:[#allocation5 + $0x250] ss:$8 sps:$4 sm:$0xff]   ;;  %v1937_v38 = vld [vmem:[#allocation7 + $0x18] sm:$0xff]   ;;  %s2122_s20 = smov [#allocation8]  }
  0x8d   : > { %1000 = vmatprep.subr.bf16.mxu0 %v1807_v19  ;;  %v1865_v19 = vld [vmem:[#allocation5 + $0x264] ss:$8 sps:$4 sm:$0xff]   ;;  %p2042_p1 = pnand %p2041_p11, %p2458_p0  ;;  %s2044_s22 = sshll.u32 %s2122_s20, 4  ;;  %s2045_s22 = int_to_ptr.vmem [resolvable:$false] %s2044_s22 }
  0x8e   : > { %956 = vmatpush1.bf16.msra.mxu1 %v1878_v42  ;;  %v1939_v42 = vld [vmem:[#allocation7 + $0x20] sm:$0xff]   ;;  %v1925_v53 = vld [vmem:[#allocation5 + $0x304] ss:$8 sps:$4 sm:$0xff]   ;;  %s2046_s29 = scalar_lea.vmem %s2045_s22, 256  ;;  %p2047_p5 = scmp.lt.s32.totalorder %s2393_s16, %s2045_s22 }
  0x8f   : > { %957 = vmatprep.subr.bf16.mxu1 %v1879_v43  ;;  %v1893_v43 = vld [vmem:[#allocation5 + $0x2b0] ss:$8 sps:$4 sm:$0xff]   ;;  %v1945_v0 = vld [vmem:[#allocation7 + $0x38] sm:$0xff]   ;;  %p2043_p3 = pneg %p2042_p1  ;;  %p2048_p9 = scmp.lt.s32.totalorder %s2046_s29, %s2040_s9 }
  0x90   : > { %1001 = vmatpush1.bf16.msra.mxu0 %v1809_v24  ;;  %v1871_v24 = vld [vmem:[#allocation5 + $0x274] ss:$8 sps:$4 sm:$0xff]  }
  0x91   : > { %1002 = vmatprep.subr.bf16.mxu0 %v1810_v25  ;;  %v332_v25 = vpack.c.bf16 %v325_v21, %v325_v21  ;;  %p2049_p12 = por %p2048_p9, %p2047_p5 }
  0x92   : > { %958 = vmatpush1.bf16.msra.mxu1 %v1884_v46  ;;  %v1907_v46 = vld [vmem:[#allocation5 + $0x2d4] ss:$8 sps:$4 sm:$0xff]  }
  0x93   : > { %959 = vmatprep.subr.bf16.mxu1 %v1885_v47  ;;  %v1905_v47 = vld [vmem:[#allocation5 + $0x2d0] ss:$8 sps:$4 sm:$0xff]   ;;  %p2050_p2 = pnand %p2049_p12, %p2043_p3 }
  0x94   : > { %1003 = vmatpush1.bf16.msra.mxu0 %v1812_v28  ;;  %v1869_v28 = vld [vmem:[#allocation5 + $0x270] ss:$8 sps:$4 sm:$0xff]  }
  0x95   : > { %1004 = vmatprep.subr.bf16.mxu0 %v1813_v29  ;;  %v1877_v29 = vld [vmem:[#allocation5 + $0x284] ss:$8 sps:$4 sm:$0xff]  }
  0x96   : > { %960 = vmatpush1.bf16.msra.mxu1 %v1890_v50  ;;  %v1919_v50 = vld [vmem:[#allocation5 + $0x2f4] ss:$8 sps:$4 sm:$0xff]  }
  0x97   : > { %961 = vmatprep.subr.bf16.mxu1 %v1891_v52  ;;  %v329_v52 = vld [vmem:[%s2336_s21 + $0x20] sm:$0xff] }
  0x98   : > { %1005 = vmatpush1.bf16.msra.mxu0 %v1815_v32  ;;  %v1875_v32 = vld [vmem:[#allocation5 + $0x280] ss:$8 sps:$4 sm:$0xff]  }
  0x99   : > { %1006 = vmatprep.subr.bf16.mxu0 %v1816_v33  ;;  %v1883_v33 = vld [vmem:[#allocation5 + $0x294] ss:$8 sps:$4 sm:$0xff]  }
  0x9a   : > { %962 = vmatpush1.bf16.msra.mxu1 %v1896_v55  ;;  %v1923_v55 = vld [vmem:[#allocation5 + $0x300] ss:$8 sps:$4 sm:$0xff]  }
  0x9b   : > { %963 = vmatprep.subr.bf16.mxu1 %v1897_v56  ;;  %v2119_v56 = vmov 0  }
  0x9c   : > { %1007 = vmatpush1.bf16.msra.mxu0 %v1818_v36  ;;  %v1881_v36 = vld [vmem:[#allocation5 + $0x290] ss:$8 sps:$4 sm:$0xff]  }
  0x9d   : > { %1008 = vmatprep.subr.bf16.mxu0 %v1819_v37  ;;  %v1889_v37 = vld [vmem:[#allocation5 + $0x2a4] ss:$8 sps:$4 sm:$0xff]  }
  0x9e   : > { %964 = vmatpush1.bf16.msra.mxu1 %v1902_v62  ;;  %v1943_v62 = vld [vmem:[#allocation7 + $0x30] sm:$0xff]  }
  0x9f   : > { %965 = vmatprep.subr.bf16.mxu1 %v1903_v63  ;;  %v1944_v63 = vld [vmem:[#allocation7 + $0x78] sm:$0xff]  }
  0xa0   : > { %1009 = vmatpush1.bf16.msra.mxu0 %v1821_v40  ;;  %v1887_v40 = vld [vmem:[#allocation5 + $0x2a0] ss:$8 sps:$4 sm:$0xff]  }
  0xa1   : > { %1010 = vmatprep.subr.bf16.mxu0 %v1822_v41  ;;  %v1895_v41 = vld [vmem:[#allocation5 + $0x2b4] ss:$8 sps:$4 sm:$0xff]  }
  0xa2   : > { %966 = vmatpush1.bf16.msra.mxu1 %v1908_v4 }
  0xa3   : > { %967 = vmatprep.subr.bf16.mxu1 %v1909_v5 }
  0xa4   : > { %1011 = vmatpush1.bf16.msra.mxu0 %v1824_v44  ;;  %v1901_v44 = vld [vmem:[#allocation5 + $0x2c4] ss:$8 sps:$4 sm:$0xff]  }
  0xa5   : > { %1012 = vmatprep.subr.bf16.mxu0 %v1825_v45  ;;  %v1899_v45 = vld [vmem:[#allocation5 + $0x2c0] ss:$8 sps:$4 sm:$0xff]  }
  0xa6   : > { %968 = vmatpush1.bf16.msra.mxu1 %v1914_v8 }
  0xa7   : > { %969 = vmatprep.subr.bf16.mxu1 %v1915_v9  ;;  %v437_v9 = vld [vmem:[%s2437_s2] sm:$0x3] }
  0xa8   : > { %1013 = vmatpush1.bf16.msra.mxu0 %v1827_v48  ;;  %v1913_v48 = vld [vmem:[#allocation5 + $0x2e4] ss:$8 sps:$4 sm:$0xff]  }
  0xa9   : > { %1014 = vmatprep.subr.bf16.mxu0 %v1828_v49  ;;  %v1911_v49 = vld [vmem:[#allocation5 + $0x2e0] ss:$8 sps:$4 sm:$0xff]  }
  0xaa   : > { %970 = vmatpush1.bf16.msra.mxu1 %v1920_v13 }
  0xab   : > { %971 = vmatprep.subr.bf16.mxu1 %v1921_v14 }
  0xac   : > { %1015 = vmatpush1.bf16.msra.mxu0 %v1830_v51  ;;  %v1917_v51 = vld [vmem:[#allocation5 + $0x2f0] ss:$8 sps:$4 sm:$0xff]  }
  0xad   : > { %1025 = vmatprep.subr.bf16.mxu0 %v1833_v54  ;;  %v336_v54 = vpack.c.bf16 %v329_v52, %v329_v52 }
  0xae   : > { %972 = vmatpush1.bf16.msra.mxu1 %v1926_v16 }
  0xaf   : > { %1017 = vmatmul.mubr.bf16.vlgmr.msra.gmra.mrb[0].mxu0 %v334_v57  ;;  %973 = vmatprep.subr.bf16.mxu1 %v1927_v17  ;;  %v331_v57 = vld [vmem:[%s2336_s21 + $0x30] sm:$0xff] }
  0xb0   : > { %1026 = vmatpush1.bf16.msra.mxu0 %v1831_v59  ;;  %1057 = vmatprep.mubr.bf16.mxu0 %v337_v60  ;;  %v338_v58 = vpack.c.bf16 %v331_v57, %v331_v57  ;;  %v1940_v59 = vld [vmem:[#allocation7 + $0x68] sm:$0xff]  }
  0xb1   : > { %1027 = vmatprep.subr.bf16.mxu0 %v1836_v61  ;;  %v1941_v60 = vld [vmem:[#allocation7 + $0x28] sm:$0xff]   ;;  %v1942_v61 = vld [vmem:[#allocation7 + $0x70] sm:$0xff]  }
  0xb2   : > { %974 = vmatpush1.bf16.msra.mxu1 %v1929_v20 }
  0xb3   : > { %1643 = vmatprep.subr.bf16.mxu1 %v1930_v22 }
  0xb4   : > { %1028 = vmatpush1.bf16.msra.mxu0 %v1834_v1  ;;  %v2120_v1 = vmov 0.0  }
  0xb5   : > { %1029 = vmatprep.subr.bf16.mxu0 %v1841_v3  ;;  %976 = vmatmul.mubr.bf16.vlgmr.msra.gmra.mrb[0].mxu1 %v332_v25 }
  0xb6   : > { %1644 = vmatpush3.bf16.msra.mxu1 %v1931_v26  ;;  %v1947_v26 = vld [vmem:[%s2440_s5 + $0x8] sm:$0xff]  }
  0xb7   : > { %1645 = vmatprep.subr.bf16.mxu1 %v1932_v27  ;;  %v1948_v27 = vld [vmem:[%s2440_s5 + $0x10] sm:$0xff]  }
  0xb8   : > { %1030 = vmatpush1.bf16.msra.mxu0 %v1839_v6  ;;  %v439_v6 = vlaneseq }
  0xb9   : > { %1031 = vmatprep.subr.bf16.mxu0 %v1847_v7 }
  0xba   : > { %1646 = vmatpush3.bf16.msra.mxu1 %v1933_v30  ;;  %v440_v7 = vshrl.u32 %v439_v6, 7  ;;  %v1951_v30 = vld [vmem:[%s2440_s5 + $0x28] sm:$0xff]  }
  0xbb   : > { %1647 = vmatprep.subr.bf16.mxu1 %v1934_v31  ;;  %v1952_v31 = vld [vmem:[%s2440_s5 + $0x30] sm:$0xff]  }
  0xbc   : > { %1032 = vmatpush1.bf16.msra.mxu0 %v1845_v10  ;;  %v441_v8 = vsub.s32 0, %v440_v7  ;;  %v445_v10 = vsub.s32 1, %v440_v7 }
  0xbd   : > { %1033 = vmatprep.subr.bf16.mxu0 %v1853_v11 }
  0xbe   : > { %1648 = vmatpush3.bf16.msra.mxu1 %v1935_v34  ;;  %v442_v11 = vrot.slane %v437_v9, %v441_v8  ;;  %v1613_v34 = vld [vmem:[%s2439_s4] ss:$0 sm:$0xff] }
  0xbf   : > { %1649 = vmatprep.subr.bf16.mxu1 %v1936_v35 }
  0xc0   : > { %1034 = vmatpush1.bf16.msra.mxu0 %v1851_v12  ;;  %v446_v12 = vrot.slane %v437_v9, %v445_v10 }
  0xc1   : > { %1035 = vmatprep.subr.bf16.mxu0 %v1859_v15 }
  0xc2   : > { %1650 = vmatpush3.bf16.msra.mxu1 %v1937_v38 }
  0xc3   : > { %1651 = vmatprep.subr.bf16.mxu1 %v1938_v39 }
  0xc4   : > { %1036 = vmatpush1.bf16.msra.mxu0 %v1857_v18 }
  0xc5   : > { %1037 = vmatprep.subr.bf16.mxu0 %v1865_v19 }
  0xc6   : > { %1652 = vmatpush3.bf16.msra.mxu1 %v1939_v42  ;;  %v1630_v42 = vld [vmem:[%s2441_s6] ss:$0 sm:$0xff] }
  0xc7   : > { %1653 = vmatprep.subr.bf16.mxu1 %v1940_v59 }
  0xc8   : > { %1038 = vmatpush1.bf16.msra.mxu0 %v1863_v23 }
  0xc9   : > { %1039 = vmatprep.subr.bf16.mxu0 %v1871_v24  ;;  %v1946_v24 = vld [vmem:[%s2440_s5] sm:$0xff]  }
  0xca   : > { %1654 = vmatpush3.bf16.msra.mxu1 %v1941_v60 }
  0xcb   : > { %1655 = vmatprep.subr.bf16.mxu1 %v1942_v61 }
  0xcc   : > { %1040 = vmatpush1.bf16.msra.mxu0 %v1869_v28  ;;  %v1949_v28 = vld [vmem:[%s2440_s5 + $0x18] sm:$0xff]  }
  0xcd   : > { %1041 = vmatprep.subr.bf16.mxu0 %v1877_v29  ;;  %v1950_v29 = vld [vmem:[%s2440_s5 + $0x20] sm:$0xff]  }
  0xce   : > { %1656 = vmatpush3.bf16.msra.mxu1 %v1943_v62 }
  0xcf   : > { %1657 = vmatprep.subr.bf16.mxu1 %v1944_v63 }
  0xd0   : > { %1042 = vmatpush1.bf16.msra.mxu0 %v1875_v32  ;;  %v1953_v32 = vld [vmem:[%s2440_s5 + $0x38] sm:$0xff]  }
  0xd1   : > { %1043 = vmatprep.subr.bf16.mxu0 %v1883_v33 }
  0xd2   : > { %1658 = vmatpush3.bf16.msra.mxu1 %v1945_v0 }
  0xd3   : > { %1674 = vmatprep.subr.bf16.mxu1 %v2120_v1 }
  0xd4   : > { %1044 = vmatpush1.bf16.msra.mxu0 %v1881_v36 }
  0xd5   : > { %1045 = vmatprep.subr.bf16.mxu0 %v1889_v37 }
  0xd8   : > { %1046 = vmatpush1.bf16.msra.mxu0 %v1887_v40 }
  0xd9   : > { %1047 = vmatprep.subr.bf16.mxu0 %v1895_v41 }
  0xdc   : > { %1048 = vmatpush1.bf16.msra.mxu0 %v1893_v43 }
  0xdd   : > { %1049 = vmatprep.subr.bf16.mxu0 %v1901_v44 }
  0xe0   : > { %1050 = vmatpush1.bf16.msra.mxu0 %v1899_v45 }
  0xe1   : > { %1051 = vmatprep.subr.bf16.mxu0 %v1907_v46 }
  0xe4   : > { %1052 = vmatpush1.bf16.msra.mxu0 %v1905_v47 }
  0xe5   : > { %1053 = vmatprep.subr.bf16.mxu0 %v1913_v48 }
  0xe8   : > { %1054 = vmatpush1.bf16.msra.mxu0 %v1911_v49 }
  0xe9   : > { %1055 = vmatprep.subr.bf16.mxu0 %v1919_v50 }
  0xec   : > { %1056 = vmatpush1.bf16.msra.mxu0 %v1917_v51 }
  0xed   : > { %1066 = vmatprep.subr.bf16.mxu0 %v1925_v53 }
  0xef   : > { %1058 = vmatmul.mubr.bf16.vlgmr.msra.gmra.mrb[0].mxu0 %v336_v54 }
  0xf0   : > { %1067 = vmatpush1.bf16.msra.mxu0 %v1923_v55  ;;  %1098 = vmatprep.mubr.bf16.mxu0 %v2119_v56 }
  0xfb   : > { %1612 = vmatmul.mubr.msk.bf16.vlgmr.msra.gmra.mrb[0].mxu0 %vm939_vm0, %v338_v58 }
 0x188   : > { %v977_v2 = vpop.f32.mrb[0].mxu1 }
 0x189   : > { %v979_v3 = vpop.f32.mrb[1].mxu1  ;;  %v978_v13 = vadd.f32 %v977_v2, %v442_v11 }
 0x18a   : > { %v981_v4 = vpop.f32.mrb[2].mxu1  ;;  %v980_v14 = vadd.f32 %v979_v3, %v446_v12 }
 0x18b   : > { %v982_v5 = vpop.f32.mrb[3].mxu1 }
 0x1ce   : > { %v1100_v15 = vpop.f32.mrb[0].mxu0 }
 0x1cf   : > { %v1695_v16 = vadd.f32 %v1100_v15, %v978_v13  ;;  %v1102_v17 = vpop.f32.mrb[1].mxu0 }
 0x1d0   : > { %v1697_v18 = vadd.f32 %v1102_v17, %v980_v14  ;;  %v1104_v19 = vpop.f32.mrb[2].mxu0 }
 0x1d1   : > { %v1107_v20 = vmax.f32 %v1695_v16, 0.0  ;;  %v1105_v21 = vpop.f32.mrb[3].mxu0 }
 0x1d2   : > { %v1108_v22 = vmax.f32 %v1697_v18, 0.0 }
 0x1d3   : > { %v1109_v25 = vpack.c.bf16 %v1107_v20, %v1107_v20 }
 0x1d4   : > { %v1110_v23 = vpack.c.bf16 %v1108_v22, %v1108_v22 }
 0x1d6   : > { %1278 = vmatprep.mubr.bf16.mxu1 %v1110_v23 }
 0x1d7   : > { %1279 = vmatmul.mubr.bf16.vlgmr.msra.gmra.mrb[4].mxu1 %v1109_v25 }
 0x1d8   : > { %1675 = vmatpush3.bf16.msra.mxu1 %v1946_v24  ;;  %1690 = vmatprep.mubr.msk.bf16.mxu1 %vm2121_vm1, %v2120_v1 }
 0x1d9   : > { %1676 = vmatprep.subr.bf16.mxu1 %v2120_v1 }
 0x1dc   : > { %1677 = vmatpush3.bf16.msra.mxu1 %v1947_v26 }
 0x1dd   : > { %1678 = vmatprep.subr.bf16.mxu1 %v2120_v1 }
 0x1e0   : > { %1679 = vmatpush3.bf16.msra.mxu1 %v1948_v27 }
 0x1e1   : > { %1680 = vmatprep.subr.bf16.mxu1 %v2120_v1 }
 0x1e4   : > { %1681 = vmatpush3.bf16.msra.mxu1 %v1949_v28 }
 0x1e5   : > { %1682 = vmatprep.subr.bf16.mxu1 %v2120_v1 }
 0x1e8   : > { %1683 = vmatpush3.bf16.msra.mxu1 %v1950_v29 }
 0x1e9   : > { %1684 = vmatprep.subr.bf16.mxu1 %v2120_v1 }
 0x1ec   : > { %1685 = vmatpush3.bf16.msra.mxu1 %v1951_v30 }
 0x1ed   : > { %1686 = vmatprep.subr.bf16.mxu1 %v2120_v1 }
 0x1f0   : > { %1687 = vmatpush3.bf16.msra.mxu1 %v1952_v31 }
 0x1f1   : > { %1688 = vmatprep.subr.bf16.mxu1 %v2120_v1 }
 0x1f4   : > { %1689 = vmatpush3.bf16.msra.mxu1 %v1953_v32 }
 0x2aa   : > { %v1659_v33 = vpop.f32.mrb[4].mxu1 }
 0x2ab   : > { %v1660_v35 = vpop.f32.mrb[5].mxu1 }
 0x2ac   : > { %v1661_v36 = vadd.f32 %v1660_v35, %v1659_v33  ;;  %v1662_v37 = vpop.f32.mrb[6].mxu1 }
 0x2ad   : > { %v1663_v38 = vpop.f32.mrb[7].mxu1 }
 0x2ae   : > { %v1281_v39 = vadd.f32 %v1661_v36, %v1613_v34 }
 0x2b0   : > { %v1286_v40 = vmax.f32 %v1281_v39, 0.0 }
 0x2b2   : > { %v1287_v41 = vpack.c.bf16 %v1286_v40, %v1286_v40 }
 0x2b4   : > { %1691 = vmatmul.mubr.bf16.vlgmr.msra.gmra.mrb[8].mxu1 %v1287_v41 }
 0x387   : > { %v1393_v43 = vpop.f32.mrb[8].mxu1 }
 0x388   : > { %v1394_v44 = vadd.f32 %v1630_v42, %v1393_v43  ;;  %v1692_v45 = vpop.f32.mrb[9].mxu1 }
 0x389   : > { %v1396_v46 = vpop.f32.mrb[10].mxu1 }
 0x38a   : > { %v1693_v47 = vpop.f32.mrb[11].mxu1  ;;  %1400 = vst.msk [vmem:[%s323_s1] sm:$0xff] %vm1399_vm2, %v1394_v44 }
 0x38b   : > { %2053 = shalt.err (!%p2050_p2)
}
 0x38c   : > { %s2054_s15 = scalar_lea.hbm %s2391_s30, 128  ;;  %s2058_s12 = scalar_lea.hbm %s2442_s7, 256 }
 0x38d   : > { %p2055_p13 = scmp.ne.s32.totalorder %s2391_s30, %s2054_s15  ;;  %p2059_p4 = scmp.lt.u32.totalorder %s2391_s30, %s2442_s7 }
 0x38e   : > { %p2060_p7 = scmp.lt.u32.totalorder %s2058_s12, %s2054_s15  ;;  %p2062_p11 = scmp.lt.u32.totalorder %s2054_s15, %s2391_s30 }
 0x38f   : > { %p2056_p6 = pnand %p2055_p13, %p2458_p0 }
 0x390   : > { %p2061_p8 = por %p2060_p7, %p2059_p4 }
 0x391   : > { %p2057_p10 = pneg %p2056_p6 }
 0x392   : > { %p2063_p1 = por %p2062_p11, %p2061_p8 }
 0x394   : > { %p2064_p3 = pnand %p2063_p1, %p2057_p10 }
 0x396   : > { %2067 = shalt.err (!%p2064_p3)
}
 0x397   : > { %1719 = dma.vmem_to_hbm [thread:$0]  (%p2458_p0), %s2393_s16, 128, %s2391_s30, %s1402_s28  }
 0x398 PF: > { %s1427_s1 = sand.u32 1, %s2098_s24   ;;  %p2459_p5 = scmp.ne.s32.totalorder %s2448_s8, 0 }
 0x399   : > { %p2460_p9 = scmp.ge.s32.totalorder %s2110_s27, 2  ;;  %s1428_s14 = scalar_lea.sflag [#allocation4], %s1427_s1 }
 0x39b   : > { %p1733_p12 = pnand %p2460_p9, %p2459_p5 }
 0x39d   : > { %2093 = dma.done.wait (!%p1733_p12), %s1428_s14, 128  }
 0x39e   : > { %2095 = vsyncadd (!%p1733_p12), %s1428_s14, 4294967168  ;;  %p21_p2 = scmp.ge.s32.totalorder %s2273_s13, 4   ;;  %s2461_s24 = smov %s2102_s25 }
 0x39f   : > { %s2462_s25 = smov %s2106_s26  ;;  %s2463_s26 = smov %s2282_s17 }
 0x3a0   : > { %s2464_s27 = smov %s2273_s13  ;;  %23 = sbr.rel (!%p21_p2) target bundleno = 8 (0x8), region = 101 }
 0x3a7   :  { %1433 = vsyncpa [#allocation3], 1 }
 0x3a8   :  { %1435 = vsyncpa [#allocation3 + $0x1], 1 }
 0x3a9   :  { %1436 = vsyncpa [#allocation6], 1 }
 0x3aa   :  { %1437 = vsyncpa [#allocation4], 1 }
 0x3ab   :  { %1439 = vsyncpa [#allocation4 + $0x1], 1 }

</bundles_post_ra>
